<compile_context>
chip_gen: v7x
topology: tpu7x:2x2x1
jax: 0.10.0
libtpu: 0.0.40
codegen_flags: <defaults>
</compile_context>

<pallas_src>
import functools

import jax
import jax.numpy as jnp
from jax import lax
from jax.experimental import pallas as pl
from jax.experimental.pallas import tpu as pltpu


def _linear_kernel(x_ref, w_ref, b_ref, o_ref, acc_ref, *, use_bf16):
    """One (tm, tn) output tile; loops over K via grid axis 2.

    x_ref: [tm, tk]   activations
    w_ref: [tn, tk]   weight, PyTorch [outdim, indim] layout (NO transpose)
    b_ref: [1,  tn]   bias
    o_ref: [tm, tn]   output tile
    acc_ref: [tm, tn] f32 accumulator (persists across the K axis)
    """
    k = pl.program_id(2)

    @pl.when(k == 0)
    def _():
        acc_ref[...] = jnp.zeros_like(acc_ref)

    x = x_ref[...]
    w = w_ref[...]
    if use_bf16:
        x = x.astype(jnp.bfloat16)
        w = w.astype(jnp.bfloat16)

    # y[m, n] = sum_k x[m, k] * w[n, k]  (contract last dim of both -> no W^T)
    acc_ref[...] += lax.dot_general(
        x, w,
        dimension_numbers=(((1,), (1,)), ((), ())),
        preferred_element_type=jnp.float32,
    )

    @pl.when(k == pl.num_programs(2) - 1)
    def _():
        # Bias add + final cast in f32 (cheap epilogue, exact on all chips).
        o_ref[...] = (acc_ref[...] + b_ref[...]).astype(o_ref.dtype)


def _round_up(x, m):
    return ((x + m - 1) // m) * m


def _pick_tile(dim, preferred, align):
    """Largest tile <= preferred that is a multiple of `align` and covers dim."""
    return min(preferred, _round_up(dim, align))


def classifier2_forward(x, weight, bias, *, use_bf16=True,
                        tm_max=256, tn_max=512, tk_max=512):
    """classifier2.forward: fc1(x) = x @ weight.T + bias.

    x:      [..., indim]        float32
    weight: [outdim, indim]     float32 (PyTorch nn.Linear convention, not transposed)
    bias:   [outdim]            float32
    returns [..., outdim]       float32
    """
    orig_shape = x.shape
    indim = orig_shape[-1]
    outdim = weight.shape[0]
    x2d = x.reshape(-1, indim)
    B = x2d.shape[0]

    # Tile sizes: M aligned to sublanes (8), N/K aligned to lanes (128).
    # Defaults (256, 512, 512) in bf16 keep the double-buffered working set
    # well under v7x's 32 MiB scoped VMEM while still amortizing grid overhead.
    tm = _pick_tile(B, tm_max, 8)
    tn = _pick_tile(outdim, tn_max, 128)
    tk = _pick_tile(indim, tk_max, 128)

    Mp = _round_up(B, tm)
    Np = _round_up(outdim, tn)
    Kp = _round_up(indim, tk)

    # Zero-pad once in the wrapper so every block is full and lane-dense;
    # zero-padded K contributes 0 to the dot product, padded N/M rows are sliced off.
    x_p = jnp.pad(x2d, ((0, Mp - B), (0, Kp - indim)))
    w_p = jnp.pad(weight, ((0, Np - outdim), (0, Kp - indim)))
    b_p = jnp.pad(bias, (0, Np - outdim)).reshape(1, Np)

    grid = (Mp // tm, Np // tn, Kp // tk)

    kernel = functools.partial(_linear_kernel, use_bf16=use_bf16)

    flops = 2 * B * indim * outdim
    bytes_accessed = 4 * (B * indim + outdim * indim + outdim + B * outdim)

    out_p = pl.pallas_call(
        kernel,
        out_shape=jax.ShapeDtypeStruct((Mp, Np), x.dtype),
        grid=grid,
        in_specs=[
            pl.BlockSpec((tm, tk), lambda i, j, k: (i, k)),   # x tile
            pl.BlockSpec((tn, tk), lambda i, j, k: (j, k)),   # weight tile (no T)
            pl.BlockSpec((1, tn), lambda i, j, k: (0, j)),    # bias tile
        ],
        out_specs=pl.BlockSpec((tm, tn), lambda i, j, k: (i, j)),
        scratch_shapes=[pltpu.VMEM((tm, tn), jnp.float32)],
        compiler_params=pltpu.CompilerParams(
            dimension_semantics=("parallel", "parallel", "arbitrary")),
        cost_estimate=pl.CostEstimate(
            flops=flops, transcendentals=0, bytes_accessed=bytes_accessed),
    )(x_p, w_p, b_p)

    out = out_p[:B, :outdim]
    return out.reshape(orig_shape[:-1] + (outdim,))


if __name__ == "__main__":
    # Small shapes consistent with the module: x: [batch, indim] -> [batch, outdim]
    batch, indim, outdim = 8, 32, 16

    key = jax.random.PRNGKey(0)
    kx, kw, kb = jax.random.split(key, 3)

    x = jax.random.normal(kx, (batch, indim), dtype=jnp.float32)
    # Deterministic synthetic parameters (nn.Linear(indim, outdim) shapes).
    weight = jax.random.normal(kw, (outdim, indim), dtype=jnp.float32) * 0.1
    bias = jax.random.normal(kb, (outdim,), dtype=jnp.float32) * 0.1

    out = classifier2_forward(x, weight, bias)
    out = jax.block_until_ready(out)

    # Reference check against plain JAX (same semantics as torch's F.linear).
    # Tolerance loosened vs. the exact-f32 version because MXU operands are
    # rounded to bf16 (accumulation stays f32).
    ref = x @ weight.T + bias
    assert out.shape == (batch, outdim)
    assert jnp.allclose(out, ref, atol=2e-2, rtol=2e-2), (
        float(jnp.max(jnp.abs(out - ref))))

    print("KERNEL_OK")
</pallas_src>

<mosaic_0001>
module attributes {stable_mosaic.version = 11 : i64} {
  func.func @_linear_kernel(%arg0: i32, %arg1: i32, %arg2: i32, %arg3: memref<8x128xf32, #tpu.memory_space<vmem>>, %arg4: memref<128x128xf32, #tpu.memory_space<vmem>>, %arg5: memref<1x128xf32, #tpu.memory_space<vmem>>, %arg6: memref<8x128xf32, #tpu.memory_space<vmem>>, %arg7: memref<8x128xf32, #tpu.memory_space<vmem>>) attributes {dimension_semantics = [#tpu.dimension_semantics<parallel>, #tpu.dimension_semantics<parallel>, #tpu.dimension_semantics<arbitrary>], iteration_bounds = array<i64: 1, 1, 1>, scalar_prefetch = 0 : i64, scratch_operands = 1 : i64, tpu.core_type = #tpu.core_type<tc>, window_params = [{transform_indices = @transform_0, window_bounds = array<i64: 8, 128>}, {transform_indices = @transform_1, window_bounds = array<i64: 128, 128>}, {transform_indices = @transform_2, window_bounds = array<i64: 1, 128>}, {transform_indices = @transform_3, window_bounds = array<i64: 8, 128>}]} {
    %c0_i32 = arith.constant 0 : i32
    %0 = arith.cmpi eq, %arg2, %c0_i32 : i32
    %1 = arith.extui %0 : i1 to i32
    %c0_i32_0 = arith.constant 0 : i32
    %2 = arith.cmpi ne, %1, %c0_i32_0 : i32
    scf.if %2 {
      %cst_10 = arith.constant 0.000000e+00 : f32
      %14 = vector.broadcast %cst_10 : f32 to vector<8x128xf32>
      %c0_11 = arith.constant 0 : index
      %c0_12 = arith.constant 0 : index
      %15 = vector.load %arg7[%c0_11, %c0_12] : memref<8x128xf32, #tpu.memory_space<vmem>>, vector<8x128xf32>
      tpu.vector_store %arg7[%c0_11, %c0_12], %14 {strides = array<i32>} : memref<8x128xf32, #tpu.memory_space<vmem>>, vector<8x128xf32>,
    } else {
    }
    %c0 = arith.constant 0 : index
    %c0_1 = arith.constant 0 : index
    %3 = vector.load %arg3[%c0, %c0_1] : memref<8x128xf32, #tpu.memory_space<vmem>>, vector<8x128xf32>
    %c0_2 = arith.constant 0 : index
    %c0_3 = arith.constant 0 : index
    %4 = vector.load %arg4[%c0_2, %c0_3] : memref<128x128xf32, #tpu.memory_space<vmem>>, vector<128x128xf32>
    %5 = arith.truncf %3 : vector<8x128xf32> to vector<8x128xbf16>
    %6 = arith.truncf %4 : vector<128x128xf32> to vector<128x128xbf16>
    %c0_4 = arith.constant 0 : index
    %c0_5 = arith.constant 0 : index
    %7 = vector.load %arg7[%c0_4, %c0_5] : memref<8x128xf32, #tpu.memory_space<vmem>>, vector<8x128xf32>
    %cst = arith.constant dense<0.000000e+00> : vector<8x128xf32>
    %8 = tpu.matmul %5, %6, %cst {dimension_numbers = #tpu.dot_dimension_numbers<[1], [1], [0], [0], [0, 0, 1, 0], [], []>} : vector<8x128xbf16>, vector<128x128xbf16>, vector<8x128xf32> -> vector<8x128xf32>
    %9 = arith.addf %7, %8 : vector<8x128xf32>
    %c0_6 = arith.constant 0 : index
    %c0_7 = arith.constant 0 : index
    %10 = vector.load %arg7[%c0_6, %c0_7] : memref<8x128xf32, #tpu.memory_space<vmem>>, vector<8x128xf32>
    tpu.vector_store %arg7[%c0_6, %c0_7], %9 {strides = array<i32>} : memref<8x128xf32, #tpu.memory_space<vmem>>, vector<8x128xf32>,
    %c0_i32_8 = arith.constant 0 : i32
    %11 = arith.cmpi eq, %arg2, %c0_i32_8 : i32
    %12 = arith.extui %11 : i1 to i32
    %c0_i32_9 = arith.constant 0 : i32
    %13 = arith.cmpi ne, %12, %c0_i32_9 : i32
    scf.if %13 {
      %c0_10 = arith.constant 0 : index
      %c0_11 = arith.constant 0 : index
      %14 = vector.load %arg7[%c0_10, %c0_11] : memref<8x128xf32, #tpu.memory_space<vmem>>, vector<8x128xf32>
      %c0_12 = arith.constant 0 : index
      %c0_13 = arith.constant 0 : index
      %15 = vector.load %arg5[%c0_12, %c0_13] : memref<1x128xf32, #tpu.memory_space<vmem>>, vector<1x128xf32>
      %16 = vector.broadcast %15 : vector<1x128xf32> to vector<8x128xf32>
      %17 = arith.addf %14, %16 : vector<8x128xf32>
      %c0_14 = arith.constant 0 : index
      %c0_15 = arith.constant 0 : index
      %18 = vector.load %arg6[%c0_14, %c0_15] : memref<8x128xf32, #tpu.memory_space<vmem>>, vector<8x128xf32>
      tpu.vector_store %arg6[%c0_14, %c0_15], %17 {strides = array<i32>} : memref<8x128xf32, #tpu.memory_space<vmem>>, vector<8x128xf32>,
    } else {
    }
    return
  }
  func.func @transform_0(%arg0: i32, %arg1: i32, %arg2: i32) -> (i32, i32) {
    %c0_i32 = arith.constant 0 : i32
    return %arg0, %arg2 : i32, i32
  }
  func.func @transform_1(%arg0: i32, %arg1: i32, %arg2: i32) -> (i32, i32) {
    %c0_i32 = arith.constant 0 : i32
    return %arg1, %arg2 : i32, i32
  }
  func.func @transform_2(%arg0: i32, %arg1: i32, %arg2: i32) -> (i32, i32) {
    %c0_i32 = arith.constant 0 : i32
    %c0_i32_0 = arith.constant 0 : i32
    return %c0_i32, %arg1 : i32, i32
  }
  func.func @transform_3(%arg0: i32, %arg1: i32, %arg2: i32) -> (i32, i32) {
    %c0_i32 = arith.constant 0 : i32
    return %arg0, %arg1 : i32, i32
  }
}

</mosaic_0001>

<bundles_post_ra>
// kernel: tpu_custom_call.1
= control target key start
LH: loop header
LB: loop body
LE: loop exit
PB: predicated region body
PF: predicated region fallthrough
CT: control target
= control target key end

     0   :  { %8 = vsyncpa [#allocation4], 0  ;;  %s327_s0 = inlined_call_operand.hbm [shape: f32[8,128], index: 0, kind: input, shape index: {}]   ;;  %s328_s1 = inlined_call_operand.hbm [shape: f32[128,128], index: 1, kind: input, shape index: {}]   ;;  %s329_s2 = inlined_call_operand.vmem [shape: f32[1,128], index: 2, kind: input, shape index: {}]   ;;  %s330_s3 = inlined_call_operand.hbm [shape: f32[8,128], index: 3, kind: output, shape index: {}]  }
   0x1   :  { %9 = vsyncpa [#allocation7], 0 }
   0x2   :  { %10 = vsyncpa [#allocation5], 0  ;;  %s254_s12 = smov [#allocation3]   ;;  %s255_s14 = smov [#allocation6]  }
   0x3   :  { %s17_s13 = sshll.u32 %s254_s12, 4  ;;  %s26_s15 = sshll.u32 %s255_s14, 4  ;;  %s18_s13 = int_to_ptr.vmem [resolvable:$true] %s17_s13  ;;  %s281_s15 = int_to_ptr.vmem [resolvable:$true] %s26_s15 }
   0x4   :  { %s182_s18 = scalar_lea.hbm %s327_s0, 128 }
   0x5   :  { %p183_p0 = scmp.ne.s32.totalorder %s327_s0, %s182_s18  ;;  %p186_p1 = scmp.lt.u32.totalorder %s182_s18, %s327_s0 }
   0x7   :  { %p188_p2 = pnand %p186_p1, %p183_p0 }
   0x9   :  { %191 = shalt.err (!%p188_p2)
}
   0xa   :  { %s192_s23 = scalar_lea.vmem %s18_s13, 128  ;;  %p197_p4 = scmp.lt.s32.totalorder %s18_s13, %s18_s13 }
   0xb   :  { %p193_p3 = scmp.ne.s32.totalorder %s18_s13, %s192_s23  ;;  %p198_p5 = scmp.lt.s32.totalorder %s192_s23, %s192_s23 }
   0xd   :  { %p199_p6 = por %p198_p5, %p197_p4 }
   0xf   :  { %p200_p7 = pnand %p199_p6, %p193_p3 }
  0x11   :  { %203 = shalt.err (!%p200_p7)
}
  0x12   :  { %20 = dma.hbm_to_vmem [thread:$0]  %s327_s0, 128, %s18_s13, [#allocation4]  }
  0x13   :  { %s204_s28 = scalar_lea.hbm %s328_s1, 2048 }
  0x14   :  { %p205_p8 = scmp.ne.s32.totalorder %s328_s1, %s204_s28  ;;  %p208_p9 = scmp.lt.u32.totalorder %s204_s28, %s328_s1 }
  0x16   :  { %p210_p10 = pnand %p208_p9, %p205_p8 }
  0x18   :  { %213 = shalt.err (!%p210_p10)
}
  0x19   :  { %s214_s6 = scalar_lea.vmem %s281_s15, 2048  ;;  %p219_p12 = scmp.lt.s32.totalorder %s281_s15, %s281_s15 }
  0x1a   :  { %p215_p11 = scmp.ne.s32.totalorder %s281_s15, %s214_s6  ;;  %p220_p13 = scmp.lt.s32.totalorder %s214_s6, %s214_s6 }
  0x1c   :  { %p221_p0 = por %p220_p13, %p219_p12 }
  0x1e   :  { %p222_p1 = pnand %p221_p0, %p215_p11 }
  0x20   :  { %225 = shalt.err (!%p222_p1)
}
  0x21   :  { %s256_s0 = smov 128   ;;  %s257_s7 = smov 8  }
  0x22   :  { %32 = dma.hbm_to_vmem [thread:$0]  %s328_s1, 2048, %s281_s15, [#allocation7], %s256_s0, %s256_s0, %s257_s7  }
  0x23   :  { %248 = dma.done.wait [#allocation4], 128  }
  0x24   :  { %249 = vsyncadd [#allocation4], 4294967168 }
  0x25   :  { %250 = dma.done.wait [#allocation7], 2048  }
  0x26   :  { %251 = vsyncadd [#allocation7], 4294965248  ;;  %v258_v0 = vmov 0.0   ;;  %vm259_vm0 = vmmov 0   ;;  %v48_v1 = vld [vmem:[#allocation6] sm:$0xff]  ;;  %v49_v2 = vld [vmem:[#allocation6 + $0x8] sm:$0xff] }
  0x27   :  { %155 = vmatprep.subr.bf16.mxu0 %v258_v0  ;;  %171 = vmatprep.mubr.msk.bf16.mxu0 %vm259_vm0, %v258_v0  ;;  %v65_v3 = vpack.c.bf16 %v49_v2, %v48_v1  ;;  %v50_v4 = vld [vmem:[#allocation6 + $0x10] sm:$0xff]  ;;  %v51_v5 = vld [vmem:[#allocation6 + $0x18] sm:$0xff]  ;;  %v52_v7 = vld [vmem:[#allocation6 + $0x20] sm:$0xff]  ;;  %s260_s11 = smov [#allocation8]  }
  0x28   :  { %v66_v6 = vpack.c.bf16 %v51_v5, %v50_v4  ;;  %v53_v8 = vld [vmem:[#allocation6 + $0x28] sm:$0xff]  ;;  %v54_v10 = vld [vmem:[#allocation6 + $0x30] sm:$0xff]  ;;  %v55_v11 = vld [vmem:[#allocation6 + $0x38] sm:$0xff]  ;;  %s135_s12 = sshll.u32 %s260_s11, 4  ;;  %s136_s12 = int_to_ptr.vmem [resolvable:$true] %s135_s12 }
  0x29   :  { %156 = vmatpush3.bf16.xpose.msra.mxu0 %v65_v3  ;;  %v67_v9 = vpack.c.bf16 %v53_v8, %v52_v7  ;;  %v68_v12 = vpack.c.bf16 %v55_v11, %v54_v10  ;;  %v56_v13 = vld [vmem:[#allocation6 + $0x40] sm:$0xff]  ;;  %v57_v14 = vld [vmem:[#allocation6 + $0x48] sm:$0xff]  ;;  %v58_v16 = vld [vmem:[#allocation6 + $0x50] sm:$0xff]  ;;  %s226_s13 = scalar_lea.vmem %s136_s12, 128  ;;  %p231_p3 = scmp.lt.s32.totalorder %s136_s12, %s136_s12 }
  0x2a   :  { %157 = vmatprep.subr.bf16.mxu0 %v258_v0  ;;  %v69_v15 = vpack.c.bf16 %v57_v14, %v56_v13  ;;  %v59_v17 = vld [vmem:[#allocation6 + $0x58] sm:$0xff]  ;;  %v60_v19 = vld [vmem:[#allocation6 + $0x60] sm:$0xff]  ;;  %v61_v20 = vld [vmem:[#allocation6 + $0x68] sm:$0xff]  ;;  %p227_p2 = scmp.ne.s32.totalorder %s136_s12, %s226_s13  ;;  %p232_p4 = scmp.lt.s32.totalorder %s226_s13, %s226_s13 }
  0x2b   :  { %v70_v18 = vpack.c.bf16 %v59_v17, %v58_v16  ;;  %v71_v21 = vpack.c.bf16 %v61_v20, %v60_v19  ;;  %v62_v22 = vld [vmem:[#allocation6 + $0x70] sm:$0xff]  ;;  %v63_v23 = vld [vmem:[#allocation6 + $0x78] sm:$0xff] }
  0x2c   :  { %v72_v24 = vpack.c.bf16 %v63_v23, %v62_v22  ;;  %v47_v25 = vld [vmem:[#allocation3] sm:$0xff]  ;;  %p233_p5 = por %p232_p4, %p231_p3 }
  0x2d   :  { %v64_v26 = vpack.c.bf16 %v47_v25, %v47_v25  ;;  %v145_v27 = vld [vmem:[%s329_s2] ss:$0 sm:$0xff] }
  0x2e   :  { %p234_p6 = pnand %p233_p5, %p227_p2 }
  0x31   :  { %158 = vmatpush3.bf16.xpose.msra.mxu0 %v66_v6 }
  0x32   :  { %159 = vmatprep.subr.bf16.mxu0 %v258_v0 }
  0x39   :  { %160 = vmatpush3.bf16.xpose.msra.mxu0 %v67_v9 }
  0x3a   :  { %161 = vmatprep.subr.bf16.mxu0 %v258_v0 }
  0x41   :  { %162 = vmatpush3.bf16.xpose.msra.mxu0 %v68_v12 }
  0x42   :  { %163 = vmatprep.subr.bf16.mxu0 %v258_v0 }
  0x49   :  { %164 = vmatpush3.bf16.xpose.msra.mxu0 %v69_v15 }
  0x4a   :  { %165 = vmatprep.subr.bf16.mxu0 %v258_v0 }
  0x51   :  { %166 = vmatpush3.bf16.xpose.msra.mxu0 %v70_v18 }
  0x52   :  { %167 = vmatprep.subr.bf16.mxu0 %v258_v0 }
  0x59   :  { %168 = vmatpush3.bf16.xpose.msra.mxu0 %v71_v21 }
  0x5a   :  { %169 = vmatprep.subr.bf16.mxu0 %v258_v0 }
  0x61   :  { %170 = vmatpush3.bf16.xpose.msra.mxu0 %v72_v24 }
  0x68   :  { %172 = vmatmul.mubr.bf16.vlgmr.msra.gmra.mrb[0].mxu0 %v64_v26 }
 0x13b   :  { %v108_v28 = vpop.f32.mrb[0].mxu0 }
 0x13c   :  { %v127_v29 = vadd.f32 %v145_v27, %v108_v28  ;;  %v173_v30 = vpop.f32.mrb[1].mxu0 }
 0x13d   :  { %v111_v31 = vpop.f32.mrb[2].mxu0 }
 0x13e   :  { %128 = vst [vmem:[#allocation8] sm:$0xff] %v127_v29  ;;  %v174_v32 = vpop.f32.mrb[3].mxu0 }
 0x13f   :  { %237 = shalt.err (!%p234_p6)
}
 0x140   :  { %s238_s2 = scalar_lea.hbm %s330_s3, 128 }
 0x141   :  { %p239_p7 = scmp.ne.s32.totalorder %s330_s3, %s238_s2  ;;  %p242_p8 = scmp.lt.u32.totalorder %s238_s2, %s330_s3 }
 0x143   :  { %p244_p9 = pnand %p242_p8, %p239_p7 }
 0x145   :  { %247 = shalt.err (!%p244_p9)
}
 0x146   :  { %138 = dma.vmem_to_hbm [thread:$0]  %s136_s12, 128, %s330_s3, [#allocation5]  }
 0x147   :  { %252 = dma.done.wait [#allocation5], 128  }
 0x148   :  { %253 = vsyncadd [#allocation5], 4294967168 }
 0x149   :  { %142 = vsyncpa [#allocation4], 1 }
 0x14a   :  { %143 = vsyncpa [#allocation7], 1 }
 0x14b   :  { %144 = vsyncpa [#allocation5], 1 }

</bundles_post_ra>
